<compile_context>
chip_gen: v6e
topology: v6e:2x2x1
jax: 0.10.0
libtpu: 0.0.40
codegen_flags: <defaults>
</compile_context>

<pallas_src>
import functools

import jax
import jax.numpy as jnp
from jax.experimental import pallas as pl
from jax.experimental.pallas import tpu as pltpu


def _prompt_kernel(text_ref, ctx_ref, out_ref, *, d, n_ctx, max_length):
    # text_ref: (tb, W_text)   -- flattened (seq, D); only cols [0, (1+tail)*d) used
    # ctx_ref : (1, (n_ctx-1)*d) -- learned ctx rows 1..n_ctx-1, flattened
    # out_ref : (tb, max_length*d)
    tb = out_ref.shape[0]
    tail = max_length - n_ctx                      # trailing text rows 1..tail
    out_dt = out_ref.dtype

    bos = text_ref[:, 0:d].astype(out_dt)                          # text row 0
    ctx_row = ctx_ref[...].astype(out_dt)                          # (1, (n_ctx-1)*d)
    ctx_b = jnp.broadcast_to(ctx_row, (tb, (n_ctx - 1) * d))       # sublane broadcast

    pieces = [bos, ctx_b]
    if tail > 0:
        pieces.append(text_ref[:, d:(1 + tail) * d].astype(out_dt))  # text rows 1..tail
    prompts = jnp.concatenate(pieces, axis=1)

    out_ref[...] = prompts                          # single lane-dense full-tile store


def _physical_vmem_bytes():
    """Per-core physical VMEM; conservative fallback if the query is unavailable."""
    try:
        info = pltpu.get_tpu_info()
        v = getattr(info, "vmem_capacity_bytes", None)
        if v:
            return int(v)
    except Exception:
        pass
    return 64 << 20  # v7x per-TensorCore value: safe lower bound for sizing


def prompt_learner_forward(text_embeds: jnp.ndarray,
                           ctx: jnp.ndarray,
                           max_length: int) -> jnp.ndarray:
    """Pallas implementation of PromptLearner.forward.

    text_embeds: (B, L, D) with L >= max_length - (n_ctx - 1)
    ctx        : (n_ctx, D) learned context parameter (row 0 unused by forward)
    returns    : (B, max_length, D), dtype = result_type(text_embeds, ctx)
    """
    B, L, D = text_embeds.shape
    n_ctx = ctx.shape[0]
    assert ctx.shape[1] == D, (ctx.shape, D)
    assert n_ctx >= 2, "forward drops ctx row 0; need n_ctx >= 2"
    assert max_length >= n_ctx, "max_length must be >= n_ctx"

    t_need = max_length - (n_ctx - 1)              # text rows actually read: 0..t_need-1
    assert 1 <= t_need <= L, "text sequence too short for requested max_length"

    # torch.cat-style dtype promotion (do not silently downcast the fp32 ctx param).
    out_dtype = jnp.result_type(text_embeds.dtype, ctx.dtype)
    text_itemsize = jnp.dtype(text_embeds.dtype).itemsize
    ctx_itemsize = jnp.dtype(ctx.dtype).itemsize
    out_itemsize = jnp.dtype(out_dtype).itemsize

    # --- lane-dense layout: fold (seq, D) into one trailing dim -----------------
    w_text_full = L * D
    w_out = max_length * D
    w_ctx = (n_ctx - 1) * D
    # Trim the text DMA window to the columns actually read, rounded up to a
    # 128-lane multiple (capped at the full row, which is always a legal block).
    w_text = min(w_text_full, -(-(t_need * D) // 128) * 128)
    assert w_text >= t_need * D

    text_flat = text_embeds.reshape(B, w_text_full)       # bitcast-style reshape
    ctx_flat = ctx[1:].reshape(1, w_ctx)                   # drop unused ctx row 0

    # --- per-generation tile sizing ---------------------------------------------
    phys_vmem = _physical_vmem_bytes()
    # 48 MiB on v7x (64 MiB physical), 96 MiB on v5e/v6e (128 MiB physical).
    vmem_limit = int(min((phys_vmem * 3) // 4, 96 << 20))
    # Double-buffered (text+out) pair must stay well inside the limit; >=512-row
    # equivalent tiles already reach ~85% of HBM roofline, so cap at 12 MiB.
    pair_budget = int(min(vmem_limit // 4, 12 << 20))

    bytes_per_b = w_text * text_itemsize + w_out * out_itemsize
    tb = max(1, min(B, pair_budget // max(bytes_per_b, 1)))
    if B >= 16:
        tb = min(tb, B // 2)        # >=2 grid steps so v7x's 2 TCs both get work
    if tb < B and tb >= 8:
        tb = (tb // 8) * 8          # sublane-aligned batch blocks (never exceeds budget)
    tb = max(1, min(tb, B))
    grid = (pl.cdiv(B, tb),)        # ragged last block is masked by Pallas

    kernel = functools.partial(_prompt_kernel, d=D, n_ctx=n_ctx, max_length=max_length)

    cost = pl.CostEstimate(
        flops=0,
        transcendentals=0,
        bytes_accessed=int(B * w_text * text_itemsize
                           + w_ctx * ctx_itemsize
                           + B * w_out * out_itemsize),
    )

    out_flat = pl.pallas_call(
        kernel,
        out_shape=jax.ShapeDtypeStruct((B, w_out), out_dtype),
        grid_spec=pltpu.PrefetchScalarGridSpec(
            num_scalar_prefetch=0,
            grid=grid,
            in_specs=[
                pl.BlockSpec((tb, w_text), lambda b: (b, 0)),   # trimmed text window
                pl.BlockSpec((1, w_ctx), lambda b: (0, 0)),     # shared ctx[1:] param
            ],
            out_specs=pl.BlockSpec((tb, w_out), lambda b: (b, 0)),
        ),
        compiler_params=pltpu.CompilerParams(
            dimension_semantics=("parallel",),    # batch blocks split across TCs on v7x
            vmem_limit_bytes=vmem_limit,
        ),
        cost_estimate=cost,
    )(text_flat, ctx_flat)

    return out_flat.reshape(B, max_length, D)


def prompt_learner_reference(text_embeds, ctx, max_length):
    B = text_embeds.shape[0]
    n_ctx = ctx.shape[0]
    out_dtype = jnp.result_type(text_embeds.dtype, ctx.dtype)
    ctx_b = jnp.broadcast_to(ctx[None], (B,) + ctx.shape)
    return jnp.concatenate(
        (text_embeds[:, 0:1, :].astype(out_dtype),
         ctx_b[:, 1:, :].astype(out_dtype),
         text_embeds[:, 1:max_length - (n_ctx - 1), :].astype(out_dtype)),
        axis=1,
    )


if __name__ == "__main__":
    # Small, deterministic shapes consistent with the module's forward.
    B = 2            # batch
    L = 12           # text sequence length fed into forward
    D = 32           # ctx_dim (text embedding hidden size)
    n_ctx = 3        # number of context tokens (parameter rows)
    max_length = 8   # prompt max length

    key = jax.random.PRNGKey(0)
    k_text, k_ctx = jax.random.split(key)

    text_embeds = jax.random.normal(k_text, (B, L, D), dtype=jnp.float32)
    # nn.init.normal_(ctx_vectors, std=0.02) equivalent, deterministic:
    ctx = 0.02 * jax.random.normal(k_ctx, (n_ctx, D), dtype=jnp.float32)

    out = prompt_learner_forward(text_embeds, ctx, max_length)
    out = jax.block_until_ready(out)

    ref = prompt_learner_reference(text_embeds, ctx, max_length)
    assert out.shape == (B, max_length, D), out.shape
    assert out.dtype == ref.dtype, (out.dtype, ref.dtype)
    assert jnp.allclose(out, ref), "Pallas output mismatch vs reference"

    print("KERNEL_OK")
</pallas_src>

<mosaic_0001>
module attributes {stable_mosaic.version = 11 : i64} {
  func.func @_prompt_kernel(%arg0: i32, %arg1: memref<2x256xf32, #tpu.memory_space<vmem>>, %arg2: memref<1x64xf32, #tpu.memory_space<vmem>>, %arg3: memref<2x256xf32, #tpu.memory_space<vmem>>) attributes {dimension_semantics = [#tpu.dimension_semantics<parallel>], iteration_bounds = array<i64: 1>, scalar_prefetch = 0 : i64, scratch_operands = 0 : i64, tpu.core_type = #tpu.core_type<tc>, window_params = [{transform_indices = @transform_0, window_bounds = array<i64: 2, 256>}, {pipeline_mode = #tpu.pipeline_mode<synchronous>, transform_indices = @transform_1, window_bounds = array<i64: 1, 64>}, {transform_indices = @transform_2, window_bounds = array<i64: 2, 256>}]} {
    %c0 = arith.constant 0 : index
    %c0_0 = arith.constant 0 : index
    %0 = vector.load %arg1[%c0, %c0_0] : memref<2x256xf32, #tpu.memory_space<vmem>>, vector<2x32xf32>
    %c0_1 = arith.constant 0 : index
    %c0_2 = arith.constant 0 : index
    %1 = vector.load %arg2[%c0_1, %c0_2] : memref<1x64xf32, #tpu.memory_space<vmem>>, vector<1x64xf32>
    %2 = vector.shape_cast %1 : vector<1x64xf32> to vector<1x64xf32>
    %3 = vector.broadcast %2 : vector<1x64xf32> to vector<2x64xf32>
    %c0_3 = arith.constant 0 : index
    %c32 = arith.constant 32 : index
    %4 = vector.load %arg1[%c0_3, %c32] : memref<2x256xf32, #tpu.memory_space<vmem>>, vector<2x160xf32>
    %5 = tpu.concatenate %0, %3, %4 in 1 : vector<2x32xf32>, vector<2x64xf32>, vector<2x160xf32> -> vector<2x256xf32>
    %c0_4 = arith.constant 0 : index
    %c0_5 = arith.constant 0 : index
    %6 = vector.load %arg3[%c0_4, %c0_5] : memref<2x256xf32, #tpu.memory_space<vmem>>, vector<2x256xf32>
    tpu.vector_store %arg3[%c0_4, %c0_5], %5 {strides = array<i32>} : memref<2x256xf32, #tpu.memory_space<vmem>>, vector<2x256xf32>,
    return
  }
  func.func @transform_0(%arg0: i32) -> (i32, i32) {
    %c0_i32 = arith.constant 0 : i32
    %c0_i32_0 = arith.constant 0 : i32
    return %arg0, %c0_i32 : i32, i32
  }
  func.func @transform_1(%arg0: i32) -> (i32, i32) {
    %c0_i32 = arith.constant 0 : i32
    %c0_i32_0 = arith.constant 0 : i32
    %c0_i32_1 = arith.constant 0 : i32
    return %c0_i32, %c0_i32_0 : i32, i32
  }
  func.func @transform_2(%arg0: i32) -> (i32, i32) {
    %c0_i32 = arith.constant 0 : i32
    %c0_i32_0 = arith.constant 0 : i32
    return %arg0, %c0_i32 : i32, i32
  }
}

</mosaic_0001>

<bundles_post_ra>
// kernel: tpu_custom_call.1
= control target key start
LH: loop header
LB: loop body
LE: loop exit
PB: predicated region body
PF: predicated region fallthrough
CT: control target
= control target key end

     0   :  { %7 = vsyncpa [#allocation3], 0  ;;  %s160_s0 = inlined_call_operand.hbm [shape: f32[2,384], index: 0, kind: input, shape index: {}]   ;;  %s161_s1 = inlined_call_operand.vmem [shape: f32[1,64], index: 1, kind: input, shape index: {}]   ;;  %s162_s2 = inlined_call_operand.hbm [shape: f32[2,256], index: 2, kind: output, shape index: {}]  }
   0x1   :  { %8 = vsyncpa [#allocation4], 0  ;;  %s132_s9 = smov [#allocation2]  }
   0x2   :  { %s15_s10 = sshll.u32 %s132_s9, 4  ;;  %s16_s10 = int_to_ptr.vmem [resolvable:$true] %s15_s10 }
   0x3   :  { %s96_s11 = scalar_lea.vmem %s16_s10, 64  ;;  %p101_p1 = scmp.lt.s32.totalorder %s16_s10, %s16_s10 }
   0x4   :  { %p97_p0 = scmp.ne.s32.totalorder %s16_s10, %s96_s11  ;;  %p102_p2 = scmp.lt.s32.totalorder %s96_s11, %s96_s11 }
   0x6   :  { %p103_p3 = por %p102_p2, %p101_p1 }
   0x8   :  { %p104_p4 = pnand %p103_p3, %p97_p0 }
   0xa   :  { %107 = shalt.err (!%p104_p4)
}
   0xb   :  { %18 = dma.hbm_to_vmem [thread:$0]  %s160_s0, 64, %s16_s10, [#allocation3]  }
   0xc   :  { %128 = dma.done.wait [#allocation3], 64  }
   0xd   :  { %129 = vsyncadd [#allocation3], 4294967232  ;;  %v81_v0 = vld [vmem:[%s161_s1] ss:$0 sm:$0xff]  ;;  %s133_s16 = smov 32   ;;  %s134_s17 = smov 64  }
   0xe   :  { %v82_v1 = vld.sshfl [vmem:[#allocation2] sm:$0x33 pattern:$0x76325410]  ;;  %32 = vrot.lane.b32.xlu0 %v81_v0, %s133_s16  ;;  %vm51_vm0 = vcmask 261120   ;;  %vm48_vm1 = vcmask 523264  }
   0xf   :  { %v43_v2 = vcombine.high %v82_v1, %v82_v1  ;;  %v24_v4 = vld [vmem:[#allocation2] sm:$0x3]  ;;  %vm53_vm2 = vcmask 785408   ;;  %s135_s0 = smov [#allocation5]  }
  0x10   :  { %s72_s18 = sshll.u32 %s135_s0, 4  ;;  %s73_s18 = int_to_ptr.vmem [resolvable:$true] %s72_s18 }
  0x11   :  { %46 = vrot.lane.b32.xlu1 %v43_v2, %s134_s17  ;;  %s108_s1 = scalar_lea.vmem %s73_s18, 64  ;;  %p113_p6 = scmp.lt.s32.totalorder %s73_s18, %s73_s18 }
  0x12   :  { %44 = vrot.lane.b32.xlu0 %v82_v1, %s134_s17  ;;  %p109_p5 = scmp.ne.s32.totalorder %s73_s18, %s108_s1  ;;  %p114_p7 = scmp.lt.s32.totalorder %s108_s1, %s108_s1 }
  0x14   :  { %p115_p8 = por %p114_p7, %p113_p6 }
  0x16   :  { %p116_p9 = pnand %p115_p8, %p109_p5 }
  0x80   :  { %v33_v3 = vpop.permute.xlu0 %32 }
  0x81   :  { %v52_v6 = vsel %vm51_vm0, %v24_v4, %v33_v3 }
  0x83   :  { %v47_v5 = vpop.permute.xlu1 %46 }
  0x84   :  { %v45_v7 = vpop.permute.xlu0 %44 }
  0x85   :  { %v49_v8 = vsel %vm48_vm1, %v45_v7, %v47_v5  ;;  %v54_v9 = vsel %vm53_vm2, %v52_v6, %v45_v7 }
  0x86   :  { %v56_v10 = vcombine.low %v54_v9, %v49_v8 }
  0x88   :  { %83 = vst.sshfl [vmem:[#allocation5] sm:$0x33 pattern:$0x76325410] %v56_v10 }
  0x89   :  { %119 = shalt.err (!%p116_p9)
}
  0x8a   :  { %75 = dma.vmem_to_hbm [thread:$0]  %s73_s18, 64, %s162_s2, [#allocation4]  }
  0x8b   :  { %130 = dma.done.wait [#allocation4], 64  }
  0x8c   :  { %131 = vsyncadd [#allocation4], 4294967232 }
  0x8d   :  { %79 = vsyncpa [#allocation3], 1 }
  0x8e   :  { %80 = vsyncpa [#allocation4], 1 }

</bundles_post_ra>
